<compile_context>
chip_gen: v7x
topology: tpu7x:2x2x1
jax: 0.10.0
libtpu: 0.0.40
codegen_flags: <defaults>
</compile_context>

<pallas_src>
import jax
import jax.numpy as jnp
from jax.experimental import pallas as pl
from jax.experimental.pallas import tpu as pltpu


_INV_SQRT2 = 0.7071067811865476  # 1/sqrt(2) for exact (erf) GELU


def ffn_kernel(x_ref, w1_ref, b1_ref, w2_ref, b2_ref, o_ref, acc_ref):
    # x_ref:  (TM, E)   token tile (constant index along hidden axis -> stays resident)
    # w1_ref: (E, TH)   column block of W1
    # b1_ref: (1, TH)   matching slice of b1
    # w2_ref: (TH, E)   row block of W2
    # b2_ref: (1, E)    full b2
    # o_ref:  (TM, E)   output tile (written only on the last hidden step)
    # acc_ref:(TM, E)   f32 accumulator scratch (resident across the hidden axis)
    h_idx = pl.program_id(1)

    # Linear 1 partial: native-dtype operands straight into the MXU, f32 accumulation.
    h = jnp.dot(x_ref[...], w1_ref[...], preferred_element_type=jnp.float32)
    h = h + b1_ref[...].astype(jnp.float32)

    # Exact erf-based GELU (matches torch.nn.GELU() default numerics).
    h = 0.5 * h * (1.0 + jax.lax.erf(h * _INV_SQRT2))

    # Linear 2 partial: (TM, TH) @ (TH, E).
    partial = jnp.dot(h.astype(w2_ref.dtype), w2_ref[...],
                      preferred_element_type=jnp.float32)

    # First hidden block writes the accumulator directly (saves a zero-fill + RMW pass).
    @pl.when(h_idx == 0)
    def _():
        acc_ref[...] = partial

    @pl.when(h_idx != 0)
    def _():
        acc_ref[...] += partial

    @pl.when(h_idx == pl.num_programs(1) - 1)
    def _():
        o_ref[...] = (acc_ref[...] + b2_ref[...].astype(jnp.float32)).astype(o_ref.dtype)


# ---------------------------------------------------------------------------
# Tile / VMEM selection helpers (generation-aware)
# ---------------------------------------------------------------------------

def _round_up(x, m):
    return ((x + m - 1) // m) * m


def _tile_h_candidates(H):
    """Divisors of H that are multiples of 128 (descending). Falls back to [H]."""
    cands = [d for d in range(128, H + 1, 128) if H % d == 0]
    return sorted(cands, reverse=True) if cands else [H]


def _vmem_capacity_bytes():
    try:
        info = pltpu.get_tpu_info()
        cap = getattr(info, "vmem_capacity_bytes", None)
        if cap:
            return int(cap)
    except Exception:
        pass
    # Conservative fallback (sized for a 64 MiB/TC part, e.g. v7x).
    return 64 * 1024 * 1024


def _vmem_budget_bytes():
    cap = _vmem_capacity_bytes()
    if cap <= 64 * 1024 * 1024:
        # 64 MiB/TC parts (v7x): leave headroom for Mosaic internal scratch / spill slab.
        return max(cap - 12 * 1024 * 1024, 32 * 1024 * 1024)
    # 128 MiB parts (v5e/v6e): use most of it, keep ~28 MiB headroom.
    return min(int(cap * 0.8), 100 * 1024 * 1024)


def _vmem_estimate(tm, th, E, itemsize):
    return (2 * tm * E * itemsize        # x tile (double-buffered)
            + 2 * E * th * itemsize      # W1 column block (double-buffered)
            + 2 * th * E * itemsize      # W2 row block (double-buffered)
            + 2 * (th + E) * itemsize    # bias slices (double-buffered)
            + 2 * tm * E * itemsize      # output tile (double-buffered)
            + tm * E * 4                 # f32 accumulator scratch
            + 2 * tm * th * 4)           # GELU intermediate working set


def _select_tiles(M, E, H, itemsize, budget, tile_m_req, tile_h_req):
    """Pick (TM, TH): TH a multiple-of-128 divisor of H, both fitting the VMEM budget."""
    h_cands = _tile_h_candidates(H)
    tile_h = next((h for h in h_cands if h <= tile_h_req), h_cands[-1])
    tile_m = max(8, _round_up(min(tile_m_req, _round_up(M, 8)), 8))
    while _vmem_estimate(tile_m, tile_h, E, itemsize) > budget:
        smaller = [h for h in h_cands if h < tile_h]
        if smaller:
            tile_h = smaller[0]
        elif tile_m > 8:
            tile_m = max(8, _round_up(tile_m // 2, 8))
        else:
            break
    return tile_m, tile_h


# ---------------------------------------------------------------------------
# Public wrapper
# ---------------------------------------------------------------------------

def feed_forward(x, w1, b1, w2, b2, *, tile_m=512, tile_h=1024):
    """x: (B, S, E). Weights stored (in, out): w1 (E, 4E), w2 (4E, E).

    Returns (B, S, E). Eval-mode forward (dropout = identity).
    tile_m / tile_h are requests; they are clamped to legal, VMEM-fitting values.
    """
    B, S, E = x.shape
    H = w1.shape[1]  # 4 * E
    M = B * S
    itemsize = x.dtype.itemsize

    budget = _vmem_budget_bytes()
    tm, th = _select_tiles(M, E, H, itemsize, budget, tile_m, tile_h)

    M_pad = pl.cdiv(M, tm) * tm
    x2d = x.reshape(M, E)
    if M_pad != M:
        x2d = jnp.pad(x2d, ((0, M_pad - M), (0, 0)))
    b1_2d = b1.reshape(1, H)
    b2_2d = b2.reshape(1, E)

    grid = (M_pad // tm, H // th)
    num_m_tiles = grid[0]

    vmem_est = _vmem_estimate(tm, th, E, itemsize)
    vmem_limit = int(min(budget, max(2 * vmem_est, 32 * 1024 * 1024)))

    cost = pl.CostEstimate(
        flops=4 * M_pad * E * H,          # two matmuls
        transcendentals=M_pad * H,        # erf over the (M, 4E) intermediate
        # Weights (and b1) are re-streamed once per M-tile; x read + out write once.
        bytes_accessed=(num_m_tiles * (2 * E * H + H) + 2 * M_pad * E + E) * itemsize,
    )

    out2d = pl.pallas_call(
        ffn_kernel,
        out_shape=jax.ShapeDtypeStruct((M_pad, E), x.dtype),
        grid_spec=pltpu.PrefetchScalarGridSpec(
            num_scalar_prefetch=0,
            grid=grid,
            in_specs=[
                pl.BlockSpec((tm, E), lambda i, h: (i, 0)),   # x tile
                pl.BlockSpec((E, th), lambda i, h: (0, h)),   # W1 column block
                pl.BlockSpec((1, th), lambda i, h: (0, h)),   # b1 slice
                pl.BlockSpec((th, E), lambda i, h: (h, 0)),   # W2 row block
                pl.BlockSpec((1, E), lambda i, h: (0, 0)),    # b2
            ],
            out_specs=pl.BlockSpec((tm, E), lambda i, h: (i, 0)),
            scratch_shapes=[pltpu.VMEM((tm, E), jnp.float32)],
        ),
        compiler_params=pltpu.CompilerParams(
            dimension_semantics=("parallel", "arbitrary"),
            vmem_limit_bytes=vmem_limit,
        ),
        cost_estimate=cost,
    )(x2d, w1, b1_2d, w2, b2_2d)

    if M_pad != M:
        out2d = out2d[:M]
    return out2d.reshape(B, S, E)


# ---------------------------------------------------------------------------
# Reference + test harness
# ---------------------------------------------------------------------------

def _reference(x, w1, b1, w2, b2):
    B, S, E = x.shape
    h = jnp.dot(x.reshape(-1, E), w1) + b1
    h = 0.5 * h * (1.0 + jax.lax.erf(h * _INV_SQRT2))
    return (jnp.dot(h, w2) + b2).reshape(B, S, E)


def _make_params(key, E, H, dtype):
    kw1, kb1, kw2, kb2 = jax.random.split(key, 4)
    # Stored already transposed to (in, out) so the kernel computes x @ W.
    w1 = jax.random.normal(kw1, (E, H), dtype=dtype) * 0.02
    b1 = jax.random.normal(kb1, (H,), dtype=dtype) * 0.02
    w2 = jax.random.normal(kw2, (H, E), dtype=dtype) * 0.02
    b2 = jax.random.normal(kb2, (E,), dtype=dtype) * 0.02
    return w1, b1, w2, b2


if __name__ == "__main__":
    key = jax.random.PRNGKey(0)
    k1, k2, k3, k4, k5, k6 = jax.random.split(key, 6)

    # --- Test 1: module-consistent small config (embedding_dim=32, hidden=128) ---
    B, S, E = 2, 8, 32
    H = 4 * E
    x = jax.random.normal(k1, (B, S, E), dtype=jnp.float32)
    w1, b1, w2, b2 = _make_params(k2, E, H, jnp.float32)
    out = feed_forward(x, w1, b1, w2, b2)
    jax.block_until_ready(out)
    ref = _reference(x, w1, b1, w2, b2)
    assert jnp.allclose(out, ref, atol=1e-4, rtol=1e-4), "mismatch vs reference (test 1)"

    # --- Test 2: M padding, multiple M tiles and multi-step hidden accumulation ---
    B2, S2, E2 = 4, 160, 128           # M = 640 -> padded to 768 with TM=256
    H2 = 4 * E2                        # 512; TH=128 -> 4 accumulation steps
    x2 = jax.random.normal(k3, (B2, S2, E2), dtype=jnp.float32)
    w1b, b1b, w2b, b2b = _make_params(k4, E2, H2, jnp.float32)
    out2 = feed_forward(x2, w1b, b1b, w2b, b2b, tile_m=256, tile_h=128)
    jax.block_until_ready(out2)
    ref2 = _reference(x2, w1b, b1b, w2b, b2b)
    assert jnp.allclose(out2, ref2, atol=1e-4, rtol=1e-4), "mismatch vs reference (test 2)"

    # --- Test 3: default generation-aware tile selection (large requested tiles) ---
    B3, S3, E3 = 2, 520, 128           # M = 1040 -> TM clamps to 512, padded to 1536
    H3 = 4 * E3                        # 512; request 1024 -> legal TH=512 (single step)
    x3 = jax.random.normal(k5, (B3, S3, E3), dtype=jnp.float32)
    w1c, b1c, w2c, b2c = _make_params(k6, E3, H3, jnp.float32)
    out3 = feed_forward(x3, w1c, b1c, w2c, b2c)
    jax.block_until_ready(out3)
    ref3 = _reference(x3, w1c, b1c, w2c, b2c)
    assert jnp.allclose(out3, ref3, atol=1e-4, rtol=1e-4), "mismatch vs reference (test 3)"

    print("KERNEL_OK")
</pallas_src>

<mosaic_0001>
module attributes {stable_mosaic.version = 11 : i64} {
  func.func @ffn_kernel(%arg0: i32, %arg1: i32, %arg2: memref<16x32xf32, #tpu.memory_space<vmem>>, %arg3: memref<32x128xf32, #tpu.memory_space<vmem>>, %arg4: memref<1x128xf32, #tpu.memory_space<vmem>>, %arg5: memref<128x32xf32, #tpu.memory_space<vmem>>, %arg6: memref<1x32xf32, #tpu.memory_space<vmem>>, %arg7: memref<16x32xf32, #tpu.memory_space<vmem>>, %arg8: memref<16x32xf32, #tpu.memory_space<vmem>>) attributes {dimension_semantics = [#tpu.dimension_semantics<parallel>, #tpu.dimension_semantics<arbitrary>], iteration_bounds = array<i64: 1, 1>, scalar_prefetch = 0 : i64, scratch_operands = 1 : i64, tpu.core_type = #tpu.core_type<tc>, window_params = [{transform_indices = @transform_0, window_bounds = array<i64: 16, 32>}, {transform_indices = @transform_1, window_bounds = array<i64: 32, 128>}, {transform_indices = @transform_2, window_bounds = array<i64: 1, 128>}, {transform_indices = @transform_3, window_bounds = array<i64: 128, 32>}, {pipeline_mode = #tpu.pipeline_mode<synchronous>, transform_indices = @transform_4, window_bounds = array<i64: 1, 32>}, {transform_indices = @transform_5, window_bounds = array<i64: 16, 32>}]} {
    %c0 = arith.constant 0 : index
    %c0_0 = arith.constant 0 : index
    %0 = vector.load %arg2[%c0, %c0_0] : memref<16x32xf32, #tpu.memory_space<vmem>>, vector<16x32xf32>
    %c0_1 = arith.constant 0 : index
    %c0_2 = arith.constant 0 : index
    %1 = vector.load %arg3[%c0_1, %c0_2] : memref<32x128xf32, #tpu.memory_space<vmem>>, vector<32x128xf32>
    %cst = arith.constant dense<0.000000e+00> : vector<16x128xf32>
    %2 = tpu.matmul %0, %1, %cst {dimension_numbers = #tpu.dot_dimension_numbers<[1], [0], [0], [1], [0, 0, 1, 1], [], []>} : vector<16x32xf32>, vector<32x128xf32>, vector<16x128xf32> -> vector<16x128xf32>
    %c0_3 = arith.constant 0 : index
    %c0_4 = arith.constant 0 : index
    %3 = vector.load %arg4[%c0_3, %c0_4] : memref<1x128xf32, #tpu.memory_space<vmem>>, vector<1x128xf32>
    %4 = vector.broadcast %3 : vector<1x128xf32> to vector<16x128xf32>
    %5 = arith.addf %2, %4 : vector<16x128xf32>
    %cst_5 = arith.constant 5.000000e-01 : f32
    %6 = vector.broadcast %cst_5 : f32 to vector<16x128xf32>
    %7 = arith.mulf %6, %5 : vector<16x128xf32>
    %cst_6 = arith.constant 0.707106769 : f32
    %8 = vector.broadcast %cst_6 : f32 to vector<16x128xf32>
    %9 = arith.mulf %5, %8 : vector<16x128xf32>
    %10 = math.erf %9 : vector<16x128xf32>
    %cst_7 = arith.constant 1.000000e+00 : f32
    %11 = vector.broadcast %cst_7 : f32 to vector<16x128xf32>
    %12 = arith.addf %11, %10 : vector<16x128xf32>
    %13 = arith.mulf %7, %12 : vector<16x128xf32>
    %c0_8 = arith.constant 0 : index
    %c0_9 = arith.constant 0 : index
    %14 = vector.load %arg5[%c0_8, %c0_9] : memref<128x32xf32, #tpu.memory_space<vmem>>, vector<128x32xf32>
    %cst_10 = arith.constant dense<0.000000e+00> : vector<16x32xf32>
    %15 = tpu.matmul %13, %14, %cst_10 {dimension_numbers = #tpu.dot_dimension_numbers<[1], [0], [0], [1], [0, 0, 1, 1], [], []>} : vector<16x128xf32>, vector<128x32xf32>, vector<16x32xf32> -> vector<16x32xf32>
    %c0_i32 = arith.constant 0 : i32
    %16 = arith.cmpi eq, %arg1, %c0_i32 : i32
    %17 = arith.extui %16 : i1 to i32
    %c0_i32_11 = arith.constant 0 : i32
    %18 = arith.cmpi ne, %17, %c0_i32_11 : i32
    scf.if %18 {
      %c0_16 = arith.constant 0 : index
      %c0_17 = arith.constant 0 : index
      %25 = vector.load %arg8[%c0_16, %c0_17] : memref<16x32xf32, #tpu.memory_space<vmem>>, vector<16x32xf32>
      tpu.vector_store %arg8[%c0_16, %c0_17], %15 {strides = array<i32>} : memref<16x32xf32, #tpu.memory_space<vmem>>, vector<16x32xf32>,
    } else {
    }
    %c0_i32_12 = arith.constant 0 : i32
    %19 = arith.cmpi ne, %arg1, %c0_i32_12 : i32
    %20 = arith.extui %19 : i1 to i32
    %c0_i32_13 = arith.constant 0 : i32
    %21 = arith.cmpi ne, %20, %c0_i32_13 : i32
    scf.if %21 {
      %c0_16 = arith.constant 0 : index
      %c0_17 = arith.constant 0 : index
      %25 = vector.load %arg8[%c0_16, %c0_17] : memref<16x32xf32, #tpu.memory_space<vmem>>, vector<16x32xf32>
      %26 = arith.addf %25, %15 : vector<16x32xf32>
      %c0_18 = arith.constant 0 : index
      %c0_19 = arith.constant 0 : index
      %27 = vector.load %arg8[%c0_18, %c0_19] : memref<16x32xf32, #tpu.memory_space<vmem>>, vector<16x32xf32>
      tpu.vector_store %arg8[%c0_18, %c0_19], %26 {strides = array<i32>} : memref<16x32xf32, #tpu.memory_space<vmem>>, vector<16x32xf32>,
    } else {
    }
    %c0_i32_14 = arith.constant 0 : i32
    %22 = arith.cmpi eq, %arg1, %c0_i32_14 : i32
    %23 = arith.extui %22 : i1 to i32
    %c0_i32_15 = arith.constant 0 : i32
    %24 = arith.cmpi ne, %23, %c0_i32_15 : i32
    scf.if %24 {
      %c0_16 = arith.constant 0 : index
      %c0_17 = arith.constant 0 : index
      %25 = vector.load %arg8[%c0_16, %c0_17] : memref<16x32xf32, #tpu.memory_space<vmem>>, vector<16x32xf32>
      %c0_18 = arith.constant 0 : index
      %c0_19 = arith.constant 0 : index
      %26 = vector.load %arg6[%c0_18, %c0_19] : memref<1x32xf32, #tpu.memory_space<vmem>>, vector<1x32xf32>
      %27 = vector.broadcast %26 : vector<1x32xf32> to vector<16x32xf32>
      %28 = arith.addf %25, %27 : vector<16x32xf32>
      %c0_20 = arith.constant 0 : index
      %c0_21 = arith.constant 0 : index
      %29 = vector.load %arg7[%c0_20, %c0_21] : memref<16x32xf32, #tpu.memory_space<vmem>>, vector<16x32xf32>
      tpu.vector_store %arg7[%c0_20, %c0_21], %28 {strides = array<i32>} : memref<16x32xf32, #tpu.memory_space<vmem>>, vector<16x32xf32>,
    } else {
    }
    return
  }
  func.func @transform_0(%arg0: i32, %arg1: i32) -> (i32, i32) {
    %c0_i32 = arith.constant 0 : i32
    %c0_i32_0 = arith.constant 0 : i32
    return %arg0, %c0_i32 : i32, i32
  }
  func.func @transform_1(%arg0: i32, %arg1: i32) -> (i32, i32) {
    %c0_i32 = arith.constant 0 : i32
    %c0_i32_0 = arith.constant 0 : i32
    return %c0_i32, %arg1 : i32, i32
  }
  func.func @transform_2(%arg0: i32, %arg1: i32) -> (i32, i32) {
    %c0_i32 = arith.constant 0 : i32
    %c0_i32_0 = arith.constant 0 : i32
    return %c0_i32, %arg1 : i32, i32
  }
  func.func @transform_3(%arg0: i32, %arg1: i32) -> (i32, i32) {
    %c0_i32 = arith.constant 0 : i32
    %c0_i32_0 = arith.constant 0 : i32
    return %arg1, %c0_i32 : i32, i32
  }
  func.func @transform_4(%arg0: i32, %arg1: i32) -> (i32, i32) {
    %c0_i32 = arith.constant 0 : i32
    %c0_i32_0 = arith.constant 0 : i32
    %c0_i32_1 = arith.constant 0 : i32
    return %c0_i32, %c0_i32_0 : i32, i32
  }
  func.func @transform_5(%arg0: i32, %arg1: i32) -> (i32, i32) {
    %c0_i32 = arith.constant 0 : i32
    %c0_i32_0 = arith.constant 0 : i32
    return %arg0, %c0_i32 : i32, i32
  }
}

</mosaic_0001>

<bundles_post_ra>
// kernel: tpu_custom_call.1
= control target key start
LH: loop header
LB: loop body
LE: loop exit
PB: predicated region body
PF: predicated region fallthrough
CT: control target
= control target key end

     0   :  { %vm34_vm0 = vcmask 261120   ;;  %s533_s0 = inlined_call_operand.vmem [shape: f32[16,32], index: 0, kind: input, shape index: {}]   ;;  %s534_s1 = inlined_call_operand.vmem [shape: f32[32,128], index: 1, kind: input, shape index: {}]   ;;  %s535_s2 = inlined_call_operand.vmem [shape: f32[1,128], index: 2, kind: input, shape index: {}]   ;;  %s536_s3 = inlined_call_operand.vmem [shape: f32[128,32], index: 3, kind: input, shape index: {}]   ;;  %s537_s4 = inlined_call_operand.vmem [shape: f32[1,32], index: 4, kind: input, shape index: {}]   ;;  %s538_s5 = inlined_call_operand.hbm [shape: f32[16,32], index: 5, kind: output, shape index: {}]  }
   0x1   :  { %v23_v0 = vld [vmem:[%s534_s1] sm:$0xff]  ;;  %v24_v1 = vld [vmem:[%s534_s1 + $0x8] sm:$0xff]  ;;  %v25_v2 = vld [vmem:[%s534_s1 + $0x10] sm:$0xff] }
   0x2   :  { %v339_v3 = vpack.c.bf16 %v24_v1, %v23_v0  ;;  %v26_v4 = vld [vmem:[%s534_s1 + $0x18] sm:$0xff]  ;;  %v21_v5 = vld [vmem:[%s533_s0] sm:$0xff]  ;;  %v127_v8 = vld [vmem:[%s536_s3 + $0x8] sm:$0xff] }
   0x3   :  { %v343_v6 = vpack.c.bf16 %v26_v4, %v25_v2  ;;  %301 = vmatprep.mubr.msk.f32.mxu0 %vm34_vm0, %v21_v5  ;;  %v126_v7 = vld [vmem:[%s536_s3] sm:$0xff]  ;;  %v128_v9 = vld [vmem:[%s536_s3 + $0x10] sm:$0xff]  ;;  %v129_v11 = vld [vmem:[%s536_s3 + $0x18] sm:$0xff] }
   0x4   :  { %340 = vmatprep.subr.bf16.mxu0 %v339_v3  ;;  %v347_v10 = vpack.c.bf16 %v127_v8, %v126_v7  ;;  %v351_v12 = vpack.c.bf16 %v129_v11, %v128_v9  ;;  %v130_v13 = vld [vmem:[%s536_s3 + $0x20] sm:$0xff]  ;;  %v131_v14 = vld [vmem:[%s536_s3 + $0x28] sm:$0xff] }
   0x5   :  { %342 = vmatpush3.bf16.msra.mxu0 %v339_v3 }
   0x6   :  { %10 = vsyncpa [#allocation4], 0  ;;  %344 = vmatprep.subr.bf16.mxu0 %v343_v6  ;;  %348 = vmatprep.subr.bf16.mxu1 %v347_v10  ;;  %v355_v15 = vpack.c.bf16 %v131_v14, %v130_v13  ;;  %v22_v16 = vld [vmem:[%s533_s0 + $0x8] sm:$0xff]  ;;  %v132_v17 = vld [vmem:[%s536_s3 + $0x30] sm:$0xff]  ;;  %s410_s11 = smov [#allocation3]  }
   0x7   :  { %350 = vmatpush3.bf16.msra.mxu1 %v347_v10  ;;  %v133_v18 = vld [vmem:[%s536_s3 + $0x38] sm:$0xff]  ;;  %v134_v20 = vld [vmem:[%s536_s3 + $0x40] sm:$0xff]  ;;  %v135_v21 = vld [vmem:[%s536_s3 + $0x48] sm:$0xff]  ;;  %s254_s12 = sshll.u32 %s410_s11, 4  ;;  %s255_s12 = int_to_ptr.vmem [resolvable:$true] %s254_s12 }
   0x8   :  { %352 = vmatprep.subr.bf16.mxu1 %v351_v12  ;;  %v359_v19 = vpack.c.bf16 %v133_v18, %v132_v17  ;;  %v363_v22 = vpack.c.bf16 %v135_v21, %v134_v20  ;;  %v136_v23 = vld [vmem:[%s536_s3 + $0x50] sm:$0xff]  ;;  %v137_v24 = vld [vmem:[%s536_s3 + $0x58] sm:$0xff]  ;;  %v138_v26 = vld [vmem:[%s536_s3 + $0x60] sm:$0xff]  ;;  %s386_s13 = scalar_lea.vmem %s255_s12, 256  ;;  %p391_p1 = scmp.lt.s32.totalorder %s255_s12, %s255_s12 }
   0x9   :  { %346 = vmatpush3.bf16.msra.mxu0 %v343_v6  ;;  %v367_v25 = vpack.c.bf16 %v137_v24, %v136_v23  ;;  %v139_v27 = vld [vmem:[%s536_s3 + $0x68] sm:$0xff]  ;;  %v140_v29 = vld [vmem:[%s536_s3 + $0x70] sm:$0xff]  ;;  %v141_v30 = vld [vmem:[%s536_s3 + $0x78] sm:$0xff]  ;;  %p387_p0 = scmp.ne.s32.totalorder %s255_s12, %s386_s13  ;;  %p392_p2 = scmp.lt.s32.totalorder %s386_s13, %s386_s13 }
   0xa   :  { %v371_v28 = vpack.c.bf16 %v139_v27, %v138_v26  ;;  %v375_v31 = vpack.c.bf16 %v141_v30, %v140_v29  ;;  %v265_v32 = vld [vmem:[%s535_s2] ss:$0 sm:$0xff] }
   0xb   :  { %354 = vmatpush3.bf16.msra.mxu1 %v351_v12  ;;  %v268_v49 = vld [vmem:[%s537_s4] ss:$0 sm:$0xff]  ;;  %p393_p3 = por %p392_p2, %p391_p1 }
   0xc   :  { %302 = vmatmul.mubr.msk.f32.vlgmr.msra.gmra.mrb[0].mxu0 %vm34_vm0, %v22_v16  ;;  %356 = vmatprep.subr.bf16.mxu1 %v355_v15 }
   0xd   :  { %p394_p4 = pnand %p393_p3, %p387_p0 }
   0xf   :  { %358 = vmatpush3.bf16.msra.mxu1 %v355_v15 }
  0x10   :  { %360 = vmatprep.subr.bf16.mxu1 %v359_v19 }
  0x13   :  { %362 = vmatpush3.bf16.msra.mxu1 %v359_v19 }
  0x14   :  { %364 = vmatprep.subr.bf16.mxu1 %v363_v22 }
  0x17   :  { %366 = vmatpush3.bf16.msra.mxu1 %v363_v22 }
  0x18   :  { %368 = vmatprep.subr.bf16.mxu1 %v367_v25 }
  0x1b   :  { %370 = vmatpush3.bf16.msra.mxu1 %v367_v25 }
  0x1c   :  { %372 = vmatprep.subr.bf16.mxu1 %v371_v28 }
  0x1f   :  { %374 = vmatpush3.bf16.msra.mxu1 %v371_v28 }
  0x20   :  { %376 = vmatprep.subr.bf16.mxu1 %v375_v31 }
  0x23   :  { %378 = vmatpush3.bf16.msra.mxu1 %v375_v31 }
  0xdf   :  { %v303_v33 = vpop.f32.mrb[0].mxu0 }
  0xe0   :  { %v113_v34 = vadd.f32 %v303_v33, %v265_v32  ;;  %v107_v35 = vpop.f32.mrb[1].mxu0 }
  0xe1   :  { %v108_v36 = vadd.f32 %v265_v32, %v107_v35 }
  0xe2   :  { %v119_v37 = vmul.f32 0.70710677, %v113_v34  ;;  %v117_v44 = vmul.f32 0.5, %v113_v34 }
  0xe3   :  { %v118_v38 = vmul.f32 0.70710677, %v108_v36  ;;  %v116_v42 = vmul.f32 0.5, %v108_v36 }
  0xe4   :  { %382 = verf.f32 %v119_v37 }
  0xe5   :  { %384 = verf.f32 %v118_v38 }
  0xee   :  { %v383_v39 = vpop.eup %382 }
  0xef   :  { %v385_v40 = vpop.eup %384  ;;  %v123_v41 = vadd.f32 1.0, %v383_v39 }
  0xf0   :  { %v122_v43 = vadd.f32 1.0, %v385_v40 }
  0xf1   :  { %v125_v46 = vmul.f32 %v123_v41, %v117_v44 }
  0xf2   :  { %v124_v45 = vmul.f32 %v122_v43, %v116_v42 }
  0xf4   :  { %336 = vmatprep.mubr.f32.mxu1 %v124_v45 }
  0xf5   :  { %337 = vmatmul.mubr.f32.vlgmr.msra.gmra.mrb[0].mxu1 %v125_v46 }
 0x1c8   :  { %v338_v47 = vpop.f32.mrb[0].mxu1 }
 0x1c9   :  { %222 = vst.msk [vmem:[#allocation2 + $0x8] sm:$0xff] %vm34_vm0, %v338_v47  ;;  %v208_v48 = vpop.f32.mrb[1].mxu1 }
 0x1ca   :  { %221 = vst.msk [vmem:[#allocation2] sm:$0xff] %vm34_vm0, %v208_v48 }
 0x1d0   :  { %v237_v50 = vld [vmem:[#allocation2 + $0x8] sm:$0xff] }
 0x1d1   :  { %v236_v51 = vld [vmem:[#allocation2] sm:$0xff]  ;;  %v246_v52 = vadd.f32 %v268_v49, %v237_v50 }
 0x1d2   :  { %v245_v53 = vadd.f32 %v268_v49, %v236_v51 }
 0x1d3   :  { %248 = vst.msk [vmem:[#allocation3 + $0x8] sm:$0xff] %vm34_vm0, %v246_v52 }
 0x1d4   :  { %247 = vst.msk [vmem:[#allocation3] sm:$0xff] %vm34_vm0, %v245_v53 }
 0x1d5   :  { %397 = shalt.err (!%p394_p4)
}
 0x1d6   :  { %s398_s15 = scalar_lea.hbm %s538_s5, 256 }
 0x1d7   :  { %p399_p5 = scmp.ne.s32.totalorder %s538_s5, %s398_s15  ;;  %p402_p6 = scmp.lt.u32.totalorder %s398_s15, %s538_s5 }
 0x1d9   :  { %p404_p7 = pnand %p402_p6, %p399_p5 }
 0x1db   :  { %407 = shalt.err (!%p404_p7)
}
 0x1dc   :  { %s411_s20 = smov 128   ;;  %s412_s21 = smov 8  }
 0x1dd   :  { %260 = dma.vmem_to_hbm [thread:$0]  %s255_s12, 256, %s538_s5, [#allocation4], %s411_s20, %s411_s20, %s412_s21  }
 0x1de   :  { %408 = dma.done.wait [#allocation4], 256  }
 0x1df   :  { %409 = vsyncadd [#allocation4], 4294967040 }
 0x1e0   :  { %264 = vsyncpa [#allocation4], 1 }

</bundles_post_ra>
